<compile_context>
chip_gen: v7x
topology: tpu7x:2x2x1
jax: 0.10.0
libtpu: 0.0.40
codegen_flags: <defaults>
</compile_context>

<pallas_src>
import jax
import jax.numpy as jnp
from jax.experimental import pallas as pl
from jax.experimental.pallas import tpu as pltpu


def autopool_kernel(alpha_ref, x_ref, o_ref):
    # alpha_ref : SMEM (1,) scalar-prefetch autopool parameter
    # x_ref     : VMEM (tr, L) tile; L = G*W, i.e. G independent width-W rows
    #             packed side by side along the lane dimension.
    # o_ref     : VMEM (tr, G) weighted-sum output, one value per packed row.
    alpha = alpha_ref[0]
    G = o_ref.shape[-1]
    L = x_ref.shape[-1]
    W = L // G

    x = x_ref[...].astype(jnp.float32)   # one dense load of the packed tile
    s = x * alpha                        # dense VPU op over all packed rows

    # Statically-unrolled segmented softmax-weighted-sum over the G width-W
    # lane segments.  Compute waste on the narrow slices is irrelevant: the
    # kernel is HBM-bandwidth bound and VPU/EUP/XLU have slack.
    for g in range(G):
        lo, hi = g * W, (g + 1) * W
        ss = s[:, lo:hi]                                   # (tr, W)
        sx = x[:, lo:hi]                                   # (tr, W)
        m = jnp.max(ss, axis=-1, keepdims=True)            # (tr, 1)
        e = jnp.exp(ss - m)                                 # EUP
        num = jnp.sum(sx * e, axis=-1, keepdims=True)       # (tr, 1)
        den = jnp.sum(e, axis=-1, keepdims=True)            # (tr, 1)
        o_ref[:, g:g + 1] = (num * pl.reciprocal(den, approx=False)
                             ).astype(o_ref.dtype)


def _round_up(a, b):
    return -(-a // b) * b


def _sublane_multiple(itemsize):
    # f32 -> 8, bf16/f16 -> 16, int8/fp8 -> 32 (packed sublane granularity).
    return {4: 8, 2: 16, 1: 32}.get(itemsize, 8)


def _pick_row_tile(nrows, lane_w, itemsize):
    """Rows per block for the packed (nrows, lane_w) array.

    ~1 MiB input blocks saturate HBM bandwidth; larger blocks only lengthen the
    un-overlapped prologue DMA.  Additionally keep >= 8 grid steps whenever the
    row count allows (pipelining depth; dual-TensorCore sharding on v7x).
    """
    sub = _sublane_multiple(itemsize)
    if nrows <= sub:
        return nrows, sub            # single block == whole (tiny) array
    lanes = _round_up(lane_w, 128)   # VMEM lane padding of the block
    tr = ((1 << 20) // (lanes * itemsize) // sub) * sub
    tr = max(sub, tr)
    tr = min(tr, max(sub, _round_up(pl.cdiv(nrows, 8), sub)))
    return tr, sub


def _vmem_limit_bytes(tr, lane_w, in_item, out_lanes, out_item):
    # Double-buffered input + output blocks plus headroom for Mosaic scratch;
    # blocks are ~1 MiB by construction so this stays in [16, 32] MiB and never
    # crowds v7x's 64 MiB per-TensorCore VMEM.
    in_block = tr * _round_up(lane_w, 128) * max(in_item, 1)
    out_block = tr * _round_up(out_lanes, 128) * max(out_item, 1)
    need = 2 * (in_block + out_block) + (8 << 20)
    return int(max(16 << 20, min(need, 32 << 20)))


def autopool_weight_forward(x, autopool_param):
    """x: (B, C, H, W) float array; autopool_param: scalar. Returns (B, C, H, 1)."""
    B, C, H, W = x.shape
    R = B * C * H
    in_item = jnp.dtype(x.dtype).itemsize

    # Lane packing factor: G consecutive rows per packed row.  Capped to bound
    # the static unroll of the in-kernel segmented reduction.
    G = max(1, min(128 // max(W, 1), 32))
    L = G * W
    Rp = _round_up(R, G)

    x2d = x.reshape(R, W)
    if Rp != R:
        # Zero-padded rows compute cleanly (den = W) and are sliced off below.
        # TODO(synk): the pad copies the input once; only hit when B*C*H % G != 0.
        x2d = jnp.pad(x2d, ((0, Rp - R), (0, 0)))
    nrows = Rp // G
    xp = x2d.reshape(nrows, L)           # row-major reshape: no data movement

    tr, _ = _pick_row_tile(nrows, L, in_item)
    grid = pl.cdiv(nrows, tr)
    vmem_limit = _vmem_limit_bytes(tr, L, in_item, G, in_item)

    alpha = jnp.asarray(autopool_param, jnp.float32).reshape(1)

    cost = pl.CostEstimate(
        flops=6 * R * W,                 # scale, sub-max, x*e, reductions
        transcendentals=R * W,           # exp
        bytes_accessed=R * W * in_item + R * in_item,
    )

    out_packed = pl.pallas_call(
        autopool_kernel,
        out_shape=jax.ShapeDtypeStruct((nrows, G), x.dtype),
        grid_spec=pltpu.PrefetchScalarGridSpec(
            num_scalar_prefetch=1,       # alpha lives in SMEM for the whole call
            grid=(grid,),
            in_specs=[pl.BlockSpec((tr, L), lambda i, *_: (i, 0))],
            out_specs=pl.BlockSpec((tr, G), lambda i, *_: (i, 0)),
        ),
        compiler_params=pltpu.CompilerParams(
            dimension_semantics=("parallel",),
            vmem_limit_bytes=vmem_limit,
        ),
        cost_estimate=cost,
    )(alpha, xp)

    return out_packed.reshape(Rp)[:R].reshape(B, C, H, 1)


def autopool_weight_reference(x, autopool_param):
    s = x * autopool_param
    m = jnp.max(s, axis=3, keepdims=True)
    e = jnp.exp(s - m)
    w = e / jnp.sum(e, axis=3, keepdims=True)
    return jnp.sum(x * w, axis=3, keepdims=True)


if __name__ == "__main__":
    key = jax.random.PRNGKey(0)

    # Small demo shape consistent with the module (NCHW).
    B, C, H, W = 2, 4, 16, 16
    x = jax.random.normal(key, (B, C, H, W), dtype=jnp.float32)
    autopool_param = jnp.float32(0.0)    # matches nn.Parameter(torch.tensor(0.0))

    out = jax.block_until_ready(autopool_weight_forward(x, autopool_param))
    ref = autopool_weight_reference(x, autopool_param)
    assert out.shape == (B, C, H, 1)
    assert jnp.allclose(out, ref, atol=1e-5, rtol=1e-5)

    # Larger shape: multi-step grid after lane packing (8 steps), nonzero alpha.
    x2 = jax.random.normal(jax.random.PRNGKey(1), (4, 8, 400, 16), dtype=jnp.float32)
    a2 = jnp.float32(0.7)
    out2 = jax.block_until_ready(autopool_weight_forward(x2, a2))
    ref2 = autopool_weight_reference(x2, a2)
    assert out2.shape == (4, 8, 400, 1)
    assert jnp.allclose(out2, ref2, atol=1e-5, rtol=1e-5)

    # Odd shape: B*C*H not a multiple of G (exercises the zero-padding path).
    x3 = jax.random.normal(jax.random.PRNGKey(2), (2, 3, 7, 8), dtype=jnp.float32)
    a3 = jnp.float32(-1.3)
    out3 = jax.block_until_ready(autopool_weight_forward(x3, a3))
    ref3 = autopool_weight_reference(x3, a3)
    assert out3.shape == (2, 3, 7, 1)
    assert jnp.allclose(out3, ref3, atol=1e-5, rtol=1e-5)

    print("KERNEL_OK")
</pallas_src>

<mosaic_0001>
module attributes {stable_mosaic.version = 11 : i64} {
  func.func @autopool_kernel(%arg0: i32, %arg1: memref<1xf32, #tpu.memory_space<smem>>, %arg2: memref<8x128xf32, #tpu.memory_space<vmem>>, %arg3: memref<8x8xf32, #tpu.memory_space<vmem>>) attributes {dimension_semantics = [#tpu.dimension_semantics<parallel>], iteration_bounds = array<i64: 2>, scalar_prefetch = 1 : i64, scratch_operands = 0 : i64, tpu.core_type = #tpu.core_type<tc>, window_params = [{transform_indices = @transform_0, window_bounds = array<i64: 8, 128>}, {transform_indices = @transform_1, window_bounds = array<i64: 8, 8>}]} {
    %c0 = arith.constant 0 : index
    %0 = memref.load %arg1[%c0] : memref<1xf32, #tpu.memory_space<smem>>
    %c0_0 = arith.constant 0 : index
    %c0_1 = arith.constant 0 : index
    %1 = vector.load %arg2[%c0_0, %c0_1] : memref<8x128xf32, #tpu.memory_space<vmem>>, vector<8x128xf32>
    %2 = vector.broadcast %0 : f32 to vector<8x128xf32>
    %3 = arith.mulf %1, %2 : vector<8x128xf32>
    %4 = vector.extract_strided_slice %3 {offsets = [0, 0], sizes = [8, 16], strides = [1, 1]} : vector<8x128xf32> to vector<8x16xf32>
    %5 = vector.extract_strided_slice %1 {offsets = [0, 0], sizes = [8, 16], strides = [1, 1]} : vector<8x128xf32> to vector<8x16xf32>
    %cst = arith.constant dense<0xFF800000> : vector<8xf32>
    %6 = vector.multi_reduction <maximumf>, %4, %cst [1] : vector<8x16xf32> to vector<8xf32>
    %7 = vector.shape_cast %6 : vector<8xf32> to vector<8x1xf32>
    %8 = vector.broadcast %7 : vector<8x1xf32> to vector<8x16xf32>
    %9 = arith.subf %4, %8 : vector<8x16xf32>
    %10 = math.exp %9 : vector<8x16xf32>
    %11 = arith.mulf %5, %10 : vector<8x16xf32>
    %cst_2 = arith.constant dense<0.000000e+00> : vector<8xf32>
    %12 = vector.multi_reduction <add>, %11, %cst_2 [1] : vector<8x16xf32> to vector<8xf32>
    %13 = vector.shape_cast %12 : vector<8xf32> to vector<8x1xf32>
    %cst_3 = arith.constant dense<0.000000e+00> : vector<8xf32>
    %14 = vector.multi_reduction <add>, %10, %cst_3 [1] : vector<8x16xf32> to vector<8xf32>
    %15 = vector.shape_cast %14 : vector<8xf32> to vector<8x1xf32>
    %16 = tpu.reciprocal %15 : vector<8x1xf32> -> vector<8x1xf32>
    %17 = arith.mulf %13, %16 : vector<8x1xf32>
    %c0_4 = arith.constant 0 : index
    %c0_5 = arith.constant 0 : index
    %18 = vector.load %arg3[%c0_4, %c0_5] : memref<8x8xf32, #tpu.memory_space<vmem>>, vector<8x1xf32>
    tpu.vector_store %arg3[%c0_4, %c0_5], %17 {strides = array<i32>} : memref<8x8xf32, #tpu.memory_space<vmem>>, vector<8x1xf32>,
    %19 = vector.extract_strided_slice %3 {offsets = [0, 16], sizes = [8, 16], strides = [1, 1]} : vector<8x128xf32> to vector<8x16xf32>
    %20 = vector.extract_strided_slice %1 {offsets = [0, 16], sizes = [8, 16], strides = [1, 1]} : vector<8x128xf32> to vector<8x16xf32>
    %cst_6 = arith.constant dense<0xFF800000> : vector<8xf32>
    %21 = vector.multi_reduction <maximumf>, %19, %cst_6 [1] : vector<8x16xf32> to vector<8xf32>
    %22 = vector.shape_cast %21 : vector<8xf32> to vector<8x1xf32>
    %23 = vector.broadcast %22 : vector<8x1xf32> to vector<8x16xf32>
    %24 = arith.subf %19, %23 : vector<8x16xf32>
    %25 = math.exp %24 : vector<8x16xf32>
    %26 = arith.mulf %20, %25 : vector<8x16xf32>
    %cst_7 = arith.constant dense<0.000000e+00> : vector<8xf32>
    %27 = vector.multi_reduction <add>, %26, %cst_7 [1] : vector<8x16xf32> to vector<8xf32>
    %28 = vector.shape_cast %27 : vector<8xf32> to vector<8x1xf32>
    %cst_8 = arith.constant dense<0.000000e+00> : vector<8xf32>
    %29 = vector.multi_reduction <add>, %25, %cst_8 [1] : vector<8x16xf32> to vector<8xf32>
    %30 = vector.shape_cast %29 : vector<8xf32> to vector<8x1xf32>
    %31 = tpu.reciprocal %30 : vector<8x1xf32> -> vector<8x1xf32>
    %32 = arith.mulf %28, %31 : vector<8x1xf32>
    %c0_9 = arith.constant 0 : index
    %c1 = arith.constant 1 : index
    %33 = vector.load %arg3[%c0_9, %c1] : memref<8x8xf32, #tpu.memory_space<vmem>>, vector<8x1xf32>
    tpu.vector_store %arg3[%c0_9, %c1], %32 {strides = array<i32>} : memref<8x8xf32, #tpu.memory_space<vmem>>, vector<8x1xf32>,
    %34 = vector.extract_strided_slice %3 {offsets = [0, 32], sizes = [8, 16], strides = [1, 1]} : vector<8x128xf32> to vector<8x16xf32>
    %35 = vector.extract_strided_slice %1 {offsets = [0, 32], sizes = [8, 16], strides = [1, 1]} : vector<8x128xf32> to vector<8x16xf32>
    %cst_10 = arith.constant dense<0xFF800000> : vector<8xf32>
    %36 = vector.multi_reduction <maximumf>, %34, %cst_10 [1] : vector<8x16xf32> to vector<8xf32>
    %37 = vector.shape_cast %36 : vector<8xf32> to vector<8x1xf32>
    %38 = vector.broadcast %37 : vector<8x1xf32> to vector<8x16xf32>
    %39 = arith.subf %34, %38 : vector<8x16xf32>
    %40 = math.exp %39 : vector<8x16xf32>
    %41 = arith.mulf %35, %40 : vector<8x16xf32>
    %cst_11 = arith.constant dense<0.000000e+00> : vector<8xf32>
    %42 = vector.multi_reduction <add>, %41, %cst_11 [1] : vector<8x16xf32> to vector<8xf32>
    %43 = vector.shape_cast %42 : vector<8xf32> to vector<8x1xf32>
    %cst_12 = arith.constant dense<0.000000e+00> : vector<8xf32>
    %44 = vector.multi_reduction <add>, %40, %cst_12 [1] : vector<8x16xf32> to vector<8xf32>
    %45 = vector.shape_cast %44 : vector<8xf32> to vector<8x1xf32>
    %46 = tpu.reciprocal %45 : vector<8x1xf32> -> vector<8x1xf32>
    %47 = arith.mulf %43, %46 : vector<8x1xf32>
    %c0_13 = arith.constant 0 : index
    %c2 = arith.constant 2 : index
    %48 = vector.load %arg3[%c0_13, %c2] : memref<8x8xf32, #tpu.memory_space<vmem>>, vector<8x1xf32>
    tpu.vector_store %arg3[%c0_13, %c2], %47 {strides = array<i32>} : memref<8x8xf32, #tpu.memory_space<vmem>>, vector<8x1xf32>,
    %49 = vector.extract_strided_slice %3 {offsets = [0, 48], sizes = [8, 16], strides = [1, 1]} : vector<8x128xf32> to vector<8x16xf32>
    %50 = vector.extract_strided_slice %1 {offsets = [0, 48], sizes = [8, 16], strides = [1, 1]} : vector<8x128xf32> to vector<8x16xf32>
    %cst_14 = arith.constant dense<0xFF800000> : vector<8xf32>
    %51 = vector.multi_reduction <maximumf>, %49, %cst_14 [1] : vector<8x16xf32> to vector<8xf32>
    %52 = vector.shape_cast %51 : vector<8xf32> to vector<8x1xf32>
    %53 = vector.broadcast %52 : vector<8x1xf32> to vector<8x16xf32>
    %54 = arith.subf %49, %53 : vector<8x16xf32>
    %55 = math.exp %54 : vector<8x16xf32>
    %56 = arith.mulf %50, %55 : vector<8x16xf32>
    %cst_15 = arith.constant dense<0.000000e+00> : vector<8xf32>
    %57 = vector.multi_reduction <add>, %56, %cst_15 [1] : vector<8x16xf32> to vector<8xf32>
    %58 = vector.shape_cast %57 : vector<8xf32> to vector<8x1xf32>
    %cst_16 = arith.constant dense<0.000000e+00> : vector<8xf32>
    %59 = vector.multi_reduction <add>, %55, %cst_16 [1] : vector<8x16xf32> to vector<8xf32>
    %60 = vector.shape_cast %59 : vector<8xf32> to vector<8x1xf32>
    %61 = tpu.reciprocal %60 : vector<8x1xf32> -> vector<8x1xf32>
    %62 = arith.mulf %58, %61 : vector<8x1xf32>
    %c0_17 = arith.constant 0 : index
    %c3 = arith.constant 3 : index
    %63 = vector.load %arg3[%c0_17, %c3] : memref<8x8xf32, #tpu.memory_space<vmem>>, vector<8x1xf32>
    tpu.vector_store %arg3[%c0_17, %c3], %62 {strides = array<i32>} : memref<8x8xf32, #tpu.memory_space<vmem>>, vector<8x1xf32>,
    %64 = vector.extract_strided_slice %3 {offsets = [0, 64], sizes = [8, 16], strides = [1, 1]} : vector<8x128xf32> to vector<8x16xf32>
    %65 = vector.extract_strided_slice %1 {offsets = [0, 64], sizes = [8, 16], strides = [1, 1]} : vector<8x128xf32> to vector<8x16xf32>
    %cst_18 = arith.constant dense<0xFF800000> : vector<8xf32>
    %66 = vector.multi_reduction <maximumf>, %64, %cst_18 [1] : vector<8x16xf32> to vector<8xf32>
    %67 = vector.shape_cast %66 : vector<8xf32> to vector<8x1xf32>
    %68 = vector.broadcast %67 : vector<8x1xf32> to vector<8x16xf32>
    %69 = arith.subf %64, %68 : vector<8x16xf32>
    %70 = math.exp %69 : vector<8x16xf32>
    %71 = arith.mulf %65, %70 : vector<8x16xf32>
    %cst_19 = arith.constant dense<0.000000e+00> : vector<8xf32>
    %72 = vector.multi_reduction <add>, %71, %cst_19 [1] : vector<8x16xf32> to vector<8xf32>
    %73 = vector.shape_cast %72 : vector<8xf32> to vector<8x1xf32>
    %cst_20 = arith.constant dense<0.000000e+00> : vector<8xf32>
    %74 = vector.multi_reduction <add>, %70, %cst_20 [1] : vector<8x16xf32> to vector<8xf32>
    %75 = vector.shape_cast %74 : vector<8xf32> to vector<8x1xf32>
    %76 = tpu.reciprocal %75 : vector<8x1xf32> -> vector<8x1xf32>
    %77 = arith.mulf %73, %76 : vector<8x1xf32>
    %c0_21 = arith.constant 0 : index
    %c4 = arith.constant 4 : index
    %78 = vector.load %arg3[%c0_21, %c4] : memref<8x8xf32, #tpu.memory_space<vmem>>, vector<8x1xf32>
    tpu.vector_store %arg3[%c0_21, %c4], %77 {strides = array<i32>} : memref<8x8xf32, #tpu.memory_space<vmem>>, vector<8x1xf32>,
    %79 = vector.extract_strided_slice %3 {offsets = [0, 80], sizes = [8, 16], strides = [1, 1]} : vector<8x128xf32> to vector<8x16xf32>
    %80 = vector.extract_strided_slice %1 {offsets = [0, 80], sizes = [8, 16], strides = [1, 1]} : vector<8x128xf32> to vector<8x16xf32>
    %cst_22 = arith.constant dense<0xFF800000> : vector<8xf32>
    %81 = vector.multi_reduction <maximumf>, %79, %cst_22 [1] : vector<8x16xf32> to vector<8xf32>
    %82 = vector.shape_cast %81 : vector<8xf32> to vector<8x1xf32>
    %83 = vector.broadcast %82 : vector<8x1xf32> to vector<8x16xf32>
    %84 = arith.subf %79, %83 : vector<8x16xf32>
    %85 = math.exp %84 : vector<8x16xf32>
    %86 = arith.mulf %80, %85 : vector<8x16xf32>
    %cst_23 = arith.constant dense<0.000000e+00> : vector<8xf32>
    %87 = vector.multi_reduction <add>, %86, %cst_23 [1] : vector<8x16xf32> to vector<8xf32>
    %88 = vector.shape_cast %87 : vector<8xf32> to vector<8x1xf32>
    %cst_24 = arith.constant dense<0.000000e+00> : vector<8xf32>
    %89 = vector.multi_reduction <add>, %85, %cst_24 [1] : vector<8x16xf32> to vector<8xf32>
    %90 = vector.shape_cast %89 : vector<8xf32> to vector<8x1xf32>
    %91 = tpu.reciprocal %90 : vector<8x1xf32> -> vector<8x1xf32>
    %92 = arith.mulf %88, %91 : vector<8x1xf32>
    %c0_25 = arith.constant 0 : index
    %c5 = arith.constant 5 : index
    %93 = vector.load %arg3[%c0_25, %c5] : memref<8x8xf32, #tpu.memory_space<vmem>>, vector<8x1xf32>
    tpu.vector_store %arg3[%c0_25, %c5], %92 {strides = array<i32>} : memref<8x8xf32, #tpu.memory_space<vmem>>, vector<8x1xf32>,
    %94 = vector.extract_strided_slice %3 {offsets = [0, 96], sizes = [8, 16], strides = [1, 1]} : vector<8x128xf32> to vector<8x16xf32>
    %95 = vector.extract_strided_slice %1 {offsets = [0, 96], sizes = [8, 16], strides = [1, 1]} : vector<8x128xf32> to vector<8x16xf32>
    %cst_26 = arith.constant dense<0xFF800000> : vector<8xf32>
    %96 = vector.multi_reduction <maximumf>, %94, %cst_26 [1] : vector<8x16xf32> to vector<8xf32>
    %97 = vector.shape_cast %96 : vector<8xf32> to vector<8x1xf32>
    %98 = vector.broadcast %97 : vector<8x1xf32> to vector<8x16xf32>
    %99 = arith.subf %94, %98 : vector<8x16xf32>
    %100 = math.exp %99 : vector<8x16xf32>
    %101 = arith.mulf %95, %100 : vector<8x16xf32>
    %cst_27 = arith.constant dense<0.000000e+00> : vector<8xf32>
    %102 = vector.multi_reduction <add>, %101, %cst_27 [1] : vector<8x16xf32> to vector<8xf32>
    %103 = vector.shape_cast %102 : vector<8xf32> to vector<8x1xf32>
    %cst_28 = arith.constant dense<0.000000e+00> : vector<8xf32>
    %104 = vector.multi_reduction <add>, %100, %cst_28 [1] : vector<8x16xf32> to vector<8xf32>
    %105 = vector.shape_cast %104 : vector<8xf32> to vector<8x1xf32>
    %106 = tpu.reciprocal %105 : vector<8x1xf32> -> vector<8x1xf32>
    %107 = arith.mulf %103, %106 : vector<8x1xf32>
    %c0_29 = arith.constant 0 : index
    %c6 = arith.constant 6 : index
    %108 = vector.load %arg3[%c0_29, %c6] : memref<8x8xf32, #tpu.memory_space<vmem>>, vector<8x1xf32>
    tpu.vector_store %arg3[%c0_29, %c6], %107 {strides = array<i32>} : memref<8x8xf32, #tpu.memory_space<vmem>>, vector<8x1xf32>,
    %109 = vector.extract_strided_slice %3 {offsets = [0, 112], sizes = [8, 16], strides = [1, 1]} : vector<8x128xf32> to vector<8x16xf32>
    %110 = vector.extract_strided_slice %1 {offsets = [0, 112], sizes = [8, 16], strides = [1, 1]} : vector<8x128xf32> to vector<8x16xf32>
    %cst_30 = arith.constant dense<0xFF800000> : vector<8xf32>
    %111 = vector.multi_reduction <maximumf>, %109, %cst_30 [1] : vector<8x16xf32> to vector<8xf32>
    %112 = vector.shape_cast %111 : vector<8xf32> to vector<8x1xf32>
    %113 = vector.broadcast %112 : vector<8x1xf32> to vector<8x16xf32>
    %114 = arith.subf %109, %113 : vector<8x16xf32>
    %115 = math.exp %114 : vector<8x16xf32>
    %116 = arith.mulf %110, %115 : vector<8x16xf32>
    %cst_31 = arith.constant dense<0.000000e+00> : vector<8xf32>
    %117 = vector.multi_reduction <add>, %116, %cst_31 [1] : vector<8x16xf32> to vector<8xf32>
    %118 = vector.shape_cast %117 : vector<8xf32> to vector<8x1xf32>
    %cst_32 = arith.constant dense<0.000000e+00> : vector<8xf32>
    %119 = vector.multi_reduction <add>, %115, %cst_32 [1] : vector<8x16xf32> to vector<8xf32>
    %120 = vector.shape_cast %119 : vector<8xf32> to vector<8x1xf32>
    %121 = tpu.reciprocal %120 : vector<8x1xf32> -> vector<8x1xf32>
    %122 = arith.mulf %118, %121 : vector<8x1xf32>
    %c0_33 = arith.constant 0 : index
    %c7 = arith.constant 7 : index
    %123 = vector.load %arg3[%c0_33, %c7] : memref<8x8xf32, #tpu.memory_space<vmem>>, vector<8x1xf32>
    tpu.vector_store %arg3[%c0_33, %c7], %122 {strides = array<i32>} : memref<8x8xf32, #tpu.memory_space<vmem>>, vector<8x1xf32>,
    return
  }
  func.func @transform_0(%arg0: i32, %arg1: memref<1xf32, #tpu.memory_space<smem>>) -> (i32, i32) {
    %c0_i32 = arith.constant 0 : i32
    %c0_i32_0 = arith.constant 0 : i32
    return %arg0, %c0_i32 : i32, i32
  }
  func.func @transform_1(%arg0: i32, %arg1: memref<1xf32, #tpu.memory_space<smem>>) -> (i32, i32) {
    %c0_i32 = arith.constant 0 : i32
    %c0_i32_0 = arith.constant 0 : i32
    return %arg0, %c0_i32 : i32, i32
  }
}

</mosaic_0001>

<bundles_post_ra>
// kernel: tpu_custom_call.1
= control target key start
LH: loop header
LB: loop body
LE: loop exit
PB: predicated region body
PF: predicated region fallthrough
CT: control target
= control target key end

     0   :  { %s746_s0 = inlined_call_operand.<no memory space> [shape: f32[1], index: 0, kind: input, shape index: {}]   ;;  %s747_s1 = inlined_call_operand.hbm [shape: f32[16,128], index: 1, kind: input, shape index: {}]   ;;  %s748_s2 = inlined_call_operand.vmem [shape: f32[16,8], index: 2, kind: output, shape index: {}]  }
   0x1   :  { %7 = sst [smem:[#allocation3]] %s746_s0 }
   0x2   :  { %8 = vsyncpa [#allocation5], 0 }
   0x3   :  { %10 = vsyncpa [#allocation5 + $0x1], 0  ;;  %s583_s11 = smov 0   ;;  %s585_s12 = smov 0  }
   0x4   :  { %s587_s13 = smov 0   ;;  %s589_s14 = smov 0  }
   0x5 LB: > { %s602_s0 = sadd.s32 4294967295, %s555_s14   ;;  %s605_s15 = sadd.s32 1, %s555_s14   ;;  %s555_s14 = sphi %s589_s14, %s756_s14   ;;  %s551_s13 = sphi %s587_s13, %s755_s13   ;;  %s547_s12 = sphi %s585_s12, %s754_s12   ;;  %s543_s11 = sphi %s583_s11, %s753_s11  }
   0x6   : > { %s20_s16 = ssub.s32 %s555_s14, %s605_s15  ;;  %s23_s17 = sadd.s32 1, %s551_s13 }
   0x7   : > { %p21_p0 = scmp.eq.s32.totalorder %s20_s16, 0  ;;  %p30_p1 = scmp.ne.s32.totalorder %s551_s13, %s547_s12 }
   0x8   : > { %p31_p2 = scmp.eq.s32.totalorder %s555_s14, 0  ;;  %p36_p3 = scmp.ne.s32.totalorder %s547_s12, %s543_s11 }
   0x9   : > { %s615_s18 = scalar_select %p21_p0, %s551_s13, %s23_s17  }
   0xa   : > { %p32_p4 = por %p31_p2, %p30_p1  ;;  %p37_p5 = scmp.eq.s32.totalorder %s602_s0, 0 }
   0xb   : > { %p419_p6 = scmp.lt.s32.totalorder %s555_s14, 2  ;;  %s86_s20 = sand.u32 1, %s551_s13  }
   0xc   : > { %p619_p7 = por %p37_p5, %p36_p3  ;;  %s406_s21 = sshll.u32 %s86_s20, 3 }
   0xd   : > { %s407_s22 = sshll.u32 %s555_s14, 7  ;;  %s90_s26 = scalar_lea.vmem [#allocation4], %s406_s21 }
   0xe   : > { %s628_s25 = scalar_lea.hbm %s747_s1, %s407_s22  ;;  %s97_s27 = sshll.u32 %s90_s26, 4  ;;  %s630_s27 = int_to_ptr.vmem [resolvable:$true] %s97_s27 }
   0xf   : > { %p632_p8 = pnand %p419_p6, %p32_p4  ;;  %s87_s29 = scalar_lea.sflag [#allocation5], %s86_s20 }
  0x10   : > { %s491_s30 = scalar_lea.hbm %s628_s25, 128  ;;  %s496_s5 = scalar_lea.hbm %s747_s1, 256 }
  0x11   : > { %p492_p11 = scmp.ne.s32.totalorder %s628_s25, %s491_s30  ;;  %p493_p12 = pneg %p632_p8 }
  0x12   : > { %p497_p1 = scmp.lt.u32.totalorder %s628_s25, %s747_s1  ;;  %p498_p2 = scmp.lt.u32.totalorder %s496_s5, %s491_s30 }
  0x13   : > { %p494_p13 = pnand %p493_p12, %p492_p11  ;;  %p500_p4 = scmp.lt.u32.totalorder %s491_s30, %s628_s25 }
  0x14   : > { %p499_p3 = por %p498_p2, %p497_p1 }
  0x15   : > { %p495_p0 = pneg %p494_p13 }
  0x16   : > { %p501_p5 = por %p500_p4, %p499_p3 }
  0x18   : > { %p502_p6 = pnand %p501_p5, %p495_p0 }
  0x1a   : > { %505 = shalt.err (!%p502_p6)
}
  0x1b   : > { %s506_s8 = scalar_lea.vmem %s630_s27, 128  ;;  %s557_s9 = smov [#allocation4]  }
  0x1c   : > { %p507_p11 = scmp.ne.s32.totalorder %s630_s27, %s506_s8  ;;  %s511_s10 = sshll.u32 %s557_s9, 4  ;;  %s512_s10 = int_to_ptr.vmem [resolvable:$false] %s511_s10 }
  0x1d   : > { %s513_s11 = scalar_lea.vmem %s512_s10, 256  ;;  %p514_p10 = scmp.lt.s32.totalorder %s630_s27, %s512_s10 }
  0x1e   : > { %p509_p13 = pnand %p507_p11, %p493_p12  ;;  %p515_p1 = scmp.lt.s32.totalorder %s513_s11, %s506_s8 }
  0x20   : > { %p510_p9 = pneg %p509_p13  ;;  %p516_p2 = por %p515_p1, %p514_p10 }
  0x22   : > { %p517_p3 = pnand %p516_p2, %p510_p9 }
  0x24   : > { %520 = shalt.err (!%p517_p3)
}
  0x25   : > { %418 = dma.hbm_to_vmem [thread:$0]  (!%p632_p8), %s628_s25, 128, %s630_s27, %s87_s29  }
  0x26   : > { %p751_p0 = scmp.lt.s32.totalorder %s555_s14, 3  ;;  %p752_p4 = scmp.ge.s32.totalorder %s555_s14, 1 }
  0x28   : > { %p103_p12 = pnand %p752_p4, %p751_p0 }
  0x29   : > { %s108_s16 = sand.u32 (!%p103_p12), 1, %s547_s12  }
  0x2a   : > { %106 = sbr.rel (%p103_p12) target bundleno = 581 (0x245), region = 24  ;;  %s409_s17 = sshll.u32 (!%p103_p12), %s108_s16, 3 }
  0x2b   : > { %s109_s20 = scalar_lea.sflag (!%p103_p12), [#allocation5], %s108_s16  ;;  %s112_s21 = scalar_lea.vmem (!%p103_p12), [#allocation4], %s409_s17 }
  0x31   : > { %538 = dma.done.wait (%p619_p7), %s109_s20, 128  }
  0x32   : > { %540 = vsyncadd (%p619_p7), %s109_s20, 4294967168  ;;  %s134_s22 = sld [smem:[#allocation3]]  ;;  %v672_v0 = vld [vmem:[%s112_s21] sm:$0xff]  ;;  %vm156_vm0 = vcmask 261248   ;;  %vm138_vm1 = vcmask 130048   ;;  %vm182_vm2 = vcmask 392448  }
  0x33   : > { %vm208_vm3 = vcmask 523648   ;;  %vm260_vm4 = vcmask 786048   ;;  %vm234_vm5 = vcmask 654848   ;;  %vm286_vm6 = vcmask 917248   ;;  %s558_s14 = smov 112   ;;  %s559_s19 = smov 96  }
  0x34   : > { %vm312_vm7 = vcmask 1048448   ;;  %s560_s23 = smov 80   ;;  %s561_s24 = smov 48   ;;  %vm154_vm8 = vcmask 7168   ;;  %vm180_vm9 = vcmask 15368   ;;  %vm206_vm10 = vcmask 23568  }
  0x35   : > { %s562_s25 = smov 64   ;;  %s563_s26 = smov 32   ;;  %vm232_vm11 = vcmask 31768   ;;  %vm258_vm12 = vcmask 39968   ;;  %vm284_vm13 = vcmask 48168   ;;  %vm310_vm14 = vcmask 56368  }
  0x36   : > { %s564_s27 = smov 16   ;;  %p130_p7 = scmp.lt.s32.totalorder %s602_s0, 1  ;;  %vm336_vm15 = vcmask 64568  }
  0x38   : > { %v136_v1 = vstv %s134_s22  ;;  %s758_s0 = smov (!%p130_p7, %s602_s0), 1 }
  0x39   : > { %v675_v2 = vmul.f32 %v136_v1, %v672_v0  ;;  %s410_s28 = sshll.u32 %s758_s0, 3 }
  0x3a   : > { %s722_s3 = scalar_lea.vmem %s748_s2, %s410_s28 }
  0x3b   : > { %v157_v3 = vsel %vm156_vm0, %v675_v2, -inf  ;;  %v139_v4 = vsel %vm138_vm1, %v675_v2, -inf  ;;  %v183_v5 = vsel %vm182_vm2, %v675_v2, -inf  ;;  %v209_v6 = vsel %vm208_vm3, %v675_v2, -inf }
  0x3c   : > { %158 = vmax.xlane.f32.xlu1 %v157_v3  ;;  %140 = vmax.xlane.f32.xlu0 %v139_v4  ;;  %v261_v7 = vsel %vm260_vm4, %v675_v2, -inf  ;;  %v235_v8 = vsel %vm234_vm5, %v675_v2, -inf  ;;  %v287_v9 = vsel %vm286_vm6, %v675_v2, -inf  ;;  %v313_v10 = vsel %vm312_vm7, %v675_v2, -inf }
  0x40   : > { %184 = vmax.xlane.f32.xlu0 %v183_v5  ;;  %210 = vmax.xlane.f32.xlu1 %v209_v6 }
  0x44   : > { %262 = vmax.xlane.f32.xlu0 %v261_v7  ;;  %236 = vmax.xlane.f32.xlu1 %v235_v8 }
  0x48   : > { %288 = vmax.xlane.f32.xlu0 %v287_v9 }
  0x4c   : > { %314 = vmax.xlane.f32.xlu0 %v313_v10 }
  0xc9   : > { %v159_v11 = vpop.xlane.xlu1 %158  ;;  %v141_v12 = vpop.xlane.xlu0 %140 }
  0xca   : > { %v160_v13 = vsub.f32 %v675_v2, %v159_v11  ;;  %v142_v46 = vsub.f32 %v675_v2, %v141_v12 }
  0xcc   : > { %v161_v14 = vmul.f32 1.442695, %v160_v13  ;;  %v143_v47 = vmul.f32 1.442695, %v142_v46 }
  0xcd   : > { %v185_v15 = vpop.xlane.xlu0 %184  ;;  %v211_v16 = vpop.xlane.xlu1 %210 }
  0xce   : > { %459 = vpow2.f32 %v161_v14  ;;  %v186_v17 = vsub.f32 %v675_v2, %v185_v15  ;;  %v212_v18 = vsub.f32 %v675_v2, %v211_v16 }
  0xd0   : > { %v187_v19 = vmul.f32 1.442695, %v186_v17  ;;  %v213_v20 = vmul.f32 1.442695, %v212_v18 }
  0xd1   : > { %v263_v21 = vpop.xlane.xlu0 %262  ;;  %v237_v22 = vpop.xlane.xlu1 %236 }
  0xd2   : > { %461 = vpow2.f32 %v187_v19  ;;  %v264_v23 = vsub.f32 %v675_v2, %v263_v21  ;;  %v238_v24 = vsub.f32 %v675_v2, %v237_v22 }
  0xd3   : > { %463 = vpow2.f32 %v213_v20 }
  0xd4   : > { %v265_v25 = vmul.f32 1.442695, %v264_v23  ;;  %v239_v26 = vmul.f32 1.442695, %v238_v24 }
  0xd5   : > { %v289_v27 = vpop.xlane.xlu0 %288 }
  0xd6   : > { %465 = vpow2.f32 %v265_v25  ;;  %v290_v28 = vsub.f32 %v675_v2, %v289_v27 }
  0xd7   : > { %467 = vpow2.f32 %v239_v26 }
  0xd8   : > { %v460_v29 = vpop.eup %459  ;;  %v291_v30 = vmul.f32 1.442695, %v290_v28 }
  0xd9   : > { %172 = vrot.lane.b32.xlu1 %v460_v29, %s558_s14  ;;  %v315_v31 = vpop.xlane.xlu0 %314  ;;  %v163_v38 = vmul.f32 %v460_v29, %v672_v0 }
  0xda   : > { %v316_v32 = vsub.f32 %v675_v2, %v315_v31  ;;  %469 = vpow2.f32 %v291_v30 }
  0xdc   : > { %v462_v33 = vpop.eup %461  ;;  %v317_v34 = vmul.f32 1.442695, %v316_v32 }
  0xdd   : > { %198 = vrot.lane.b32.xlu1 %v462_v33, %s559_s19  ;;  %v464_v35 = vpop.eup %463  ;;  %v189_v40 = vmul.f32 %v462_v33, %v672_v0 }
  0xde   : > { %471 = vpow2.f32 %v317_v34  ;;  %v215_v42 = vmul.f32 %v464_v35, %v672_v0 }
  0xdf   : > { %473 = vpow2.f32 %v143_v47 }
  0xe0   : > { %v466_v36 = vpop.eup %465 }
  0xe1   : > { %224 = vrot.lane.b32.xlu1 %v464_v35, %s560_s23  ;;  %276 = vrot.lane.b32.xlu0 %v466_v36, %s561_s24  ;;  %v468_v37 = vpop.eup %467  ;;  %v267_v44 = vmul.f32 %v466_v36, %v672_v0 }
  0xe2   : > { %v241_v43 = vmul.f32 %v468_v37, %v672_v0 }
  0xe4   : > { %v470_v39 = vpop.eup %469 }
  0xe5   : > { %250 = vrot.lane.b32.xlu1 %v468_v37, %s562_s25  ;;  %165 = vrot.lane.b32.xlu0 %v163_v38, %s558_s14  ;;  %v293_v52 = vmul.f32 %v470_v39, %v672_v0 }
  0xe8   : > { %v472_v41 = vpop.eup %471 }
  0xe9   : > { %191 = vrot.lane.b32.xlu0 %v189_v40, %s559_s19  ;;  %302 = vrot.lane.b32.xlu1 %v470_v39, %s563_s26  ;;  %v319_v45 = vmul.f32 %v472_v41, %v672_v0  ;;  %v474_v48 = vpop.eup %473 }
  0xea   : > { %v149_v49 = vsel %vm138_vm1, %v474_v48, 0.0  ;;  %v145_v50 = vmul.f32 %v474_v48, %v672_v0 }
  0xec   : > { %v146_v51 = vsel %vm138_vm1, %v145_v50, 0.0 }
  0xed   : > { %217 = vrot.lane.b32.xlu0 %v215_v42, %s560_s23  ;;  %328 = vrot.lane.b32.xlu1 %v472_v41, %s564_s27 }
  0xf1   : > { %243 = vrot.lane.b32.xlu0 %v241_v43, %s562_s25 }
  0xf5   : > { %269 = vrot.lane.b32.xlu0 %v267_v44, %s561_s24 }
  0xf9   : > { %321 = vrot.lane.b32.xlu0 %v319_v45, %s564_s27 }
 0x111   : > { %150 = vadd.xlane.f32.xlu1 %v149_v49 }
 0x118   : > { %147 = vadd.xlane.f32.xlu0 %v146_v51 }
 0x122   : > { %295 = vrot.lane.b32.xlu1 %v293_v52, %s563_s26 }
 0x14b   : > { %v173_v53 = vpop.permute.xlu1 %172 }
 0x14c   : > { %v175_v54 = vsel %vm138_vm1, %v173_v53, 0.0 }
 0x14d   : > { %176 = vadd.xlane.f32.xlu1 %v175_v54 }
 0x14f   : > { %v199_v55 = vpop.permute.xlu1 %198 }
 0x150   : > { %v201_v56 = vsel %vm138_vm1, %v199_v55, 0.0 }
 0x151   : > { %202 = vadd.xlane.f32.xlu0 %v201_v56 }
 0x153   : > { %v225_v57 = vpop.permute.xlu1 %224  ;;  %v277_v58 = vpop.permute.xlu0 %276 }
 0x154   : > { %v227_v59 = vsel %vm138_vm1, %v225_v57, 0.0  ;;  %v279_v9 = vsel %vm138_vm1, %v277_v58, 0.0 }
 0x155   : > { %228 = vadd.xlane.f32.xlu0 %v227_v59 }
 0x157   : > { %v251_v60 = vpop.permute.xlu1 %250  ;;  %v166_v61 = vpop.permute.xlu0 %165 }
 0x158   : > { %v253_v62 = vsel %vm138_vm1, %v251_v60, 0.0  ;;  %v168_v0 = vsel %vm138_vm1, %v166_v61, 0.0 }
 0x159   : > { %254 = vadd.xlane.f32.xlu1 %v253_v62 }
 0x15b   : > { %v192_v63 = vpop.permute.xlu0 %191  ;;  %v303_v5 = vpop.permute.xlu1 %302 }
 0x15c   : > { %v194_v2 = vsel %vm138_vm1, %v192_v63, 0.0  ;;  %v305_v16 = vsel %vm138_vm1, %v303_v5, 0.0 }
 0x15d   : > { %169 = vadd.xlane.f32.xlu1 %v168_v0 }
 0x15f   : > { %v218_v1 = vpop.permute.xlu0 %217  ;;  %v329_v10 = vpop.permute.xlu1 %328 }
 0x160   : > { %v220_v4 = vsel %vm138_vm1, %v218_v1, 0.0  ;;  %v331_v11 = vsel %vm138_vm1, %v329_v10, 0.0 }
 0x161   : > { %195 = vadd.xlane.f32.xlu1 %v194_v2 }
 0x163   : > { %v244_v3 = vpop.permute.xlu0 %243 }
 0x164   : > { %v246_v7 = vsel %vm138_vm1, %v244_v3, 0.0 }
 0x165   : > { %221 = vadd.xlane.f32.xlu1 %v220_v4 }
 0x167   : > { %v270_v6 = vpop.permute.xlu0 %269 }
 0x168   : > { %v272_v8 = vsel %vm138_vm1, %v270_v6, 0.0 }
 0x169   : > { %247 = vadd.xlane.f32.xlu1 %v246_v7  ;;  %273 = vadd.xlane.f32.xlu0 %v272_v8 }
 0x16b   : > { %v322_v15 = vpop.permute.xlu0 %321 }
 0x16c   : > { %v324_v20 = vsel %vm138_vm1, %v322_v15, 0.0 }
 0x16d   : > { %280 = vadd.xlane.f32.xlu1 %v279_v9 }
 0x171   : > { %332 = vadd.xlane.f32.xlu1 %v331_v11 }
 0x19e   : > { %v151_v12 = vpop.xlane.xlu1 %150 }
 0x19f   : > { %475 = vrcp.f32 %v151_v12 }
 0x1a2   : > { %v296_v13 = vpop.permute.xlu1 %295 }
 0x1a3   : > { %v298_v14 = vsel %vm138_vm1, %v296_v13, 0.0 }
 0x1a4   : > { %299 = vadd.xlane.f32.xlu0 %v298_v14 }
 0x1a5   : > { %v148_v18 = vpop.xlane.xlu0 %147 }
 0x1a8   : > { %306 = vadd.xlane.f32.xlu0 %v305_v16 }
 0x1a9   : > { %v476_v17 = vpop.eup %475 }
 0x1aa   : > { %v153_v19 = vmul.f32 %v476_v17, %v148_v18 }
 0x1ac   : > { %155 = vst.msk [vmem:[%s722_s3] sm:$0xff] %vm154_vm8, %v153_v19  ;;  %325 = vadd.xlane.f32.xlu0 %v324_v20 }
 0x1da   : > { %v177_v21 = vpop.xlane.xlu1 %176 }
 0x1db   : > { %477 = vrcp.f32 %v177_v21 }
 0x1de   : > { %v203_v22 = vpop.xlane.xlu0 %202 }
 0x1df   : > { %479 = vrcp.f32 %v203_v22 }
 0x1e2   : > { %v229_v23 = vpop.xlane.xlu0 %228 }
 0x1e3   : > { %481 = vrcp.f32 %v229_v23 }
 0x1e5   : > { %v478_v25 = vpop.eup %477 }
 0x1e6   : > { %v255_v24 = vpop.xlane.xlu1 %254 }
 0x1e7   : > { %483 = vrcp.f32 %v255_v24 }
 0x1e9   : > { %v480_v28 = vpop.eup %479 }
 0x1ea   : > { %v170_v26 = vpop.xlane.xlu1 %169 }
 0x1eb   : > { %v179_v27 = vmul.f32 %v478_v25, %v170_v26 }
 0x1ed   : > { %181 = vst.msk [vmem:[%s722_s3] sm:$0xff] %vm180_vm9, %v179_v27  ;;  %v482_v31 = vpop.eup %481 }
 0x1ee   : > { %v196_v29 = vpop.xlane.xlu1 %195 }
 0x1ef   : > { %v205_v30 = vmul.f32 %v480_v28, %v196_v29 }
 0x1f1   : > { %207 = vst.msk [vmem:[%s722_s3] sm:$0xff] %vm206_vm10, %v205_v30  ;;  %v484_v34 = vpop.eup %483 }
 0x1f2   : > { %v222_v32 = vpop.xlane.xlu1 %221 }
 0x1f3   : > { %v231_v33 = vmul.f32 %v482_v31, %v222_v32 }
 0x1f5   : > { %233 = vst.msk [vmem:[%s722_s3] sm:$0xff] %vm232_vm11, %v231_v33 }
 0x1f6   : > { %v248_v35 = vpop.xlane.xlu1 %247  ;;  %v274_v39 = vpop.xlane.xlu0 %273 }
 0x1f7   : > { %v257_v36 = vmul.f32 %v484_v34, %v248_v35 }
 0x1f9   : > { %259 = vst.msk [vmem:[%s722_s3] sm:$0xff] %vm258_vm12, %v257_v36 }
 0x1fa   : > { %v281_v37 = vpop.xlane.xlu1 %280 }
 0x1fb   : > { %485 = vrcp.f32 %v281_v37 }
 0x1fe   : > { %v333_v42 = vpop.xlane.xlu1 %332 }
 0x205   : > { %v486_v38 = vpop.eup %485 }
 0x206   : > { %v283_v40 = vmul.f32 %v486_v38, %v274_v39 }
 0x208   : > { %285 = vst.msk [vmem:[%s722_s3] sm:$0xff] %vm284_vm13, %v283_v40 }
 0x231   : > { %v300_v41 = vpop.xlane.xlu0 %299 }
 0x235   : > { %v307_v43 = vpop.xlane.xlu0 %306 }
 0x236   : > { %487 = vrcp.f32 %v307_v43 }
 0x237   : > { %489 = vrcp.f32 %v333_v42 }
 0x239   : > { %v326_v44 = vpop.xlane.xlu0 %325 }
 0x240   : > { %v488_v45 = vpop.eup %487 }
 0x241   : > { %v490_v46 = vpop.eup %489  ;;  %v309_v47 = vmul.f32 %v488_v45, %v300_v41 }
 0x242   : > { %v335_v48 = vmul.f32 %v490_v46, %v326_v44 }
 0x243   : > { %311 = vst.msk [vmem:[%s722_s3] sm:$0xff] %vm310_vm14, %v309_v47 }
 0x244   : > { %337 = vst.msk [vmem:[%s722_s3] sm:$0xff] %vm336_vm15, %v335_v48 }
 0x245 PF: > { %p13_p8 = scmp.ge.s32.totalorder %s605_s15, 4   ;;  %s753_s11 = smov %s547_s12 }
 0x246   : > { %s754_s12 = smov %s551_s13  ;;  %s755_s13 = smov %s615_s18 }
 0x247   : > { %s756_s14 = smov %s605_s15  ;;  %15 = sbr.rel (!%p13_p8) target bundleno = 5 (0x5), region = 64 }
 0x24e   :  { %357 = vsyncpa [#allocation5], 1 }
 0x24f   :  { %359 = vsyncpa [#allocation5 + $0x1], 1 }

</bundles_post_ra>
